<compile_context>
chip_gen: v7x
topology: tpu7x:2x2x1
jax: 0.10.0
libtpu: 0.0.40
codegen_flags: <defaults>
</compile_context>

<pallas_src>
import math

import jax
import jax.numpy as jnp
from jax.experimental import pallas as pl
from jax.experimental.pallas import tpu as pltpu


def _mse_none_kernel(out_ref, img_ref, res_ref):
    # Elementwise (outputs - imgs)^2 on a lane-dense tile (unmasked full-vreg
    # vld/vst except for the ragged final grid block, which Pallas masks).
    d = out_ref[...] - img_ref[...]
    res_ref[...] = d * d


def _round_up(x, m):
    return ((x + m - 1) // m) * m


# Lane-width candidates: multiples of 128 up to 1024, widest first.
_LANE_CANDIDATES = (1024, 896, 768, 640, 512, 384, 256, 128)


def mse_loss_none(outputs, imgs):
    """Equivalent of nn.MSELoss(reduction='none')(outputs, imgs)."""
    assert outputs.shape == imgs.shape and outputs.dtype == imgs.dtype
    orig_shape = outputs.shape
    dtype = outputs.dtype
    total = int(math.prod(orig_shape))
    itemsize = jnp.dtype(dtype).itemsize
    # Dtype-aware sublane multiple: 8 for 32-bit, 16 for 16-bit, 32 for 8-bit.
    sublane = 8 * max(1, 4 // itemsize)

    # --- choose a lane-dense 2D layout -------------------------------------
    # Prefer a lane width that exactly divides `total` (no padding at all).
    lanes = 0
    for cand in _LANE_CANDIDATES:
        if total % cand == 0:
            lanes = cand
            break
    if lanes == 0:
        # Rare fallback: no multiple-of-128 divisor. Pad only the tail
        # (< lanes elements), never round rows up to the block size.
        lanes = 1024
        while lanes > 128 and total < lanes * 64:
            lanes //= 2  # stays a power-of-two multiple of 128

    rows = pl.cdiv(total, lanes)
    padded_total = rows * lanes

    # --- choose block_rows (~4 MiB per buffer, dtype-aware sublane align) ---
    target_bytes = 4 << 20
    max_block_rows = max(sublane,
                         (target_bytes // (lanes * itemsize)) // sublane * sublane)
    if rows > max_block_rows:
        block_rows = max_block_rows
    elif rows > sublane:
        # Small/medium input: split into >=2 sublane-aligned blocks so v7x can
        # shard the grid across its 2 TensorCores.
        block_rows = _round_up(pl.cdiv(rows, 2), sublane)
    else:
        # Tiny input: one block equal to the full row extent (legal even if it
        # is not sublane-aligned, since block dim == full array dim).
        block_rows = rows

    num_blocks = pl.cdiv(rows, block_rows)  # ragged final block is masked

    # --- flatten (and pad only the tail, only when unavoidable) -------------
    flat_o = outputs.reshape(-1)
    flat_i = imgs.reshape(-1)
    if padded_total != total:
        pad = padded_total - total
        flat_o = jnp.pad(flat_o, (0, pad))
        flat_i = jnp.pad(flat_i, (0, pad))
    o2 = flat_o.reshape(rows, lanes)
    i2 = flat_i.reshape(rows, lanes)

    # --- pallas call ---------------------------------------------------------
    spec = pl.BlockSpec((block_rows, lanes), lambda r: (r, 0))
    res2 = pl.pallas_call(
        _mse_none_kernel,
        out_shape=jax.ShapeDtypeStruct((rows, lanes), dtype),
        grid=(num_blocks,),
        in_specs=[spec, spec],
        out_specs=spec,
        compiler_params=pltpu.CompilerParams(
            dimension_semantics=("parallel",),
            vmem_limit_bytes=32 * 1024 * 1024,  # load-bearing on v5e; safe on v6e/v7x
        ),
        cost_estimate=pl.CostEstimate(
            flops=2 * total,
            transcendentals=0,
            bytes_accessed=3 * total * itemsize,
        ),
    )(o2, i2)

    res_flat = res2.reshape(-1)
    if padded_total != total:
        res_flat = res_flat[:total]
    return res_flat.reshape(orig_shape)


if __name__ == "__main__":
    key = jax.random.PRNGKey(0)
    k1, k2 = jax.random.split(key)
    N, C, H, W = 2, 4, 16, 16
    outputs = jax.random.normal(k1, (N, C, H, W), dtype=jnp.float32)
    imgs = jax.random.normal(k2, (N, C, H, W), dtype=jnp.float32)

    mse = jax.jit(mse_loss_none)
    res = mse(outputs, imgs)
    jax.block_until_ready(res)

    # Correctness check against pure-JAX reference.
    ref = (outputs - imgs) ** 2
    assert res.shape == (N, C, H, W)
    assert res.dtype == outputs.dtype
    assert jnp.allclose(res, ref, atol=1e-6, rtol=1e-6)
    print("KERNEL_OK")
</pallas_src>

<mosaic_0001>
module attributes {stable_mosaic.version = 11 : i64} {
  func.func @_mse_none_kernel(%arg0: i32, %arg1: memref<2x1024xf32, #tpu.memory_space<vmem>>, %arg2: memref<2x1024xf32, #tpu.memory_space<vmem>>, %arg3: memref<2x1024xf32, #tpu.memory_space<vmem>>) attributes {dimension_semantics = [#tpu.dimension_semantics<parallel>], iteration_bounds = array<i64: 1>, scalar_prefetch = 0 : i64, scratch_operands = 0 : i64, tpu.core_type = #tpu.core_type<tc>, window_params = [{transform_indices = @transform_0, window_bounds = array<i64: 2, 1024>}, {transform_indices = @transform_1, window_bounds = array<i64: 2, 1024>}, {transform_indices = @transform_2, window_bounds = array<i64: 2, 1024>}]} {
    %c0 = arith.constant 0 : index
    %c0_0 = arith.constant 0 : index
    %0 = vector.load %arg1[%c0, %c0_0] : memref<2x1024xf32, #tpu.memory_space<vmem>>, vector<2x1024xf32>
    %c0_1 = arith.constant 0 : index
    %c0_2 = arith.constant 0 : index
    %1 = vector.load %arg2[%c0_1, %c0_2] : memref<2x1024xf32, #tpu.memory_space<vmem>>, vector<2x1024xf32>
    %2 = arith.subf %0, %1 : vector<2x1024xf32>
    %3 = arith.mulf %2, %2 : vector<2x1024xf32>
    %c0_3 = arith.constant 0 : index
    %c0_4 = arith.constant 0 : index
    %4 = vector.load %arg3[%c0_3, %c0_4] : memref<2x1024xf32, #tpu.memory_space<vmem>>, vector<2x1024xf32>
    tpu.vector_store %arg3[%c0_3, %c0_4], %3 {strides = array<i32>} : memref<2x1024xf32, #tpu.memory_space<vmem>>, vector<2x1024xf32>,
    return
  }
  func.func @transform_0(%arg0: i32) -> (i32, i32) {
    %c0_i32 = arith.constant 0 : i32
    %c0_i32_0 = arith.constant 0 : i32
    return %arg0, %c0_i32 : i32, i32
  }
  func.func @transform_1(%arg0: i32) -> (i32, i32) {
    %c0_i32 = arith.constant 0 : i32
    %c0_i32_0 = arith.constant 0 : i32
    return %arg0, %c0_i32 : i32, i32
  }
  func.func @transform_2(%arg0: i32) -> (i32, i32) {
    %c0_i32 = arith.constant 0 : i32
    %c0_i32_0 = arith.constant 0 : i32
    return %arg0, %c0_i32 : i32, i32
  }
}

</mosaic_0001>

<bundles_post_ra>
// kernel: mse_loss_none.1
= control target key start
LH: loop header
LB: loop body
LE: loop exit
PB: predicated region body
PF: predicated region fallthrough
CT: control target
= control target key end

     0   :  { %s58_s0 = inlined_call_operand.vmem [shape: f32[2,1024], index: 0, kind: input, shape index: {}]   ;;  %s59_s1 = inlined_call_operand.vmem [shape: f32[2,1024], index: 1, kind: input, shape index: {}]   ;;  %s60_s2 = inlined_call_operand.vmem [shape: f32[2,1024], index: 2, kind: output, shape index: {}]  }
   0x1   :  { %v11_v0 = vld [vmem:[%s58_s0] sm:$0xff]  ;;  %v12_v2 = vld [vmem:[%s58_s0 + $0x8] sm:$0xff] }
   0x2   :  { %v13_v1 = vld [vmem:[%s59_s1] sm:$0xff]  ;;  %v14_v4 = vld [vmem:[%s59_s1 + $0x8] sm:$0xff] }
   0x3   :  { %v15_v3 = vsub.f32 %v11_v0, %v13_v1  ;;  %v16_v5 = vsub.f32 %v12_v2, %v14_v4 }
   0x5   :  { %v17_v6 = vmul.f32 %v15_v3, %v15_v3  ;;  %v18_v7 = vmul.f32 %v16_v5, %v16_v5 }
   0x7   :  { %19 = vst [vmem:[%s60_s2] sm:$0xff] %v17_v6  ;;  %20 = vst [vmem:[%s60_s2 + $0x8] sm:$0xff] %v18_v7 }

</bundles_post_ra>
